<compile_context>
chip_gen: v7x
topology: tpu7x:2x2x1
jax: 0.10.0
libtpu: 0.0.40
codegen_flags: <defaults>
</compile_context>

<pallas_src>
import jax
import jax.numpy as jnp
from jax import lax
from jax.experimental import pallas as pl
from jax.experimental.pallas import tpu as pltpu


def _round_up(x, m):
    return (x + m - 1) // m * m


def dense_kernel(x_ref, w_ref, b_ref, o_ref):
    # x_ref: (tm, tk)  input tile (f32 or bf16; cast to bf16 for the MXU)
    # w_ref: (tk, tn)  weight tile, already [K, out_dim] layout, bf16
    # b_ref: (1, tn)   bias tile, f32
    # o_ref: (tm, tn)  f32 output tile; its block index is invariant over the
    #                  K grid axis, so it stays resident in VMEM and doubles
    #                  as the accumulator (no scratch, no epilogue copy).
    k = pl.program_id(2)

    @pl.when(k == 0)
    def _init():
        # Start the accumulation from the bias (broadcast over rows).
        o_ref[...] = jnp.broadcast_to(b_ref[...].astype(jnp.float32), o_ref.shape)

    # bf16 x bf16 -> f32 on the MXU; RHS contracting dim is the sublane dim,
    # so Mosaic does not need a per-tile transpose of the weight.
    o_ref[...] += lax.dot_general(
        x_ref[...].astype(jnp.bfloat16),
        w_ref[...],
        dimension_numbers=(((1,), (0,)), ((), ())),
        preferred_element_type=jnp.float32,
    )

    @pl.when(k == pl.num_programs(2) - 1)
    def _finalize():
        o_ref[...] = jnp.maximum(o_ref[...], 0.0)   # ReLU in place


def prepare_dense_params(weight, bias, *, tk=1024):
    """One-time parameter prep (do at init time, NOT per forward call).

    weight: [out_dim, in_dim] (PyTorch nn.Linear layout), bias: [out_dim].
    Returns (w_t, bias2, tk): w_t is bf16 [K_padded, out_dim] with K
    zero-padded to a multiple of the (aligned) K tile tk; bias2 is f32 [1, out_dim].
    """
    out_dim, in_dim = weight.shape
    tk = min(tk, _round_up(in_dim, 128))        # lane/sublane aligned K tile
    k_pad = _round_up(in_dim, tk)
    w_t = jnp.transpose(weight)                 # [in_dim, out_dim]
    if k_pad != in_dim:
        w_t = jnp.pad(w_t, ((0, k_pad - in_dim), (0, 0)))
    return (w_t.astype(jnp.bfloat16),
            bias.reshape(1, out_dim).astype(jnp.float32),
            tk)


def dense_forward(x, w_t, bias2, *, tk, tm=512, tn=512):
    """x: [N, in_dim] float; w_t: bf16 [K_padded, out_dim]; bias2: f32 [1, out_dim]."""
    n_rows, in_dim = x.shape
    k_pad, out_dim = w_t.shape
    assert bias2.shape == (1, out_dim)
    assert k_pad % tk == 0 and k_pad >= in_dim

    if k_pad != in_dim:
        # Exact: padded x columns multiply zero-padded weight rows.
        x = jnp.pad(x, ((0, 0), (0, k_pad - in_dim)))

    # Clamp tiles for small problems (full-dim blocks always satisfy (8,128)).
    # NOTE (v7x): for tiny-M inference shapes keep >=2 blocks on a parallel
    # axis (shrink tn) so both TensorCores get work.
    tm = min(tm, n_rows)
    tn = min(tn, out_dim)

    grid = (pl.cdiv(n_rows, tm), pl.cdiv(out_dim, tn), k_pad // tk)

    cost = pl.CostEstimate(
        flops=2 * n_rows * k_pad * out_dim,
        transcendentals=0,
        bytes_accessed=(x.size * x.dtype.itemsize
                        + w_t.size * w_t.dtype.itemsize
                        + bias2.size * 4
                        + n_rows * out_dim * 4),
    )

    # Double-buffered operand tiles + output tile; explicit scoped-VMEM limit
    # with headroom, capped below v7x's 64 MiB physical VMEM.
    vmem_bytes = (2 * tm * tk * x.dtype.itemsize
                  + 2 * tk * tn * w_t.dtype.itemsize
                  + 2 * tn * 4
                  + 2 * tm * tn * 4)
    vmem_limit = int(min(48 * 1024 * 1024, max(16 * 1024 * 1024, 2 * vmem_bytes)))

    return pl.pallas_call(
        dense_kernel,
        out_shape=jax.ShapeDtypeStruct((n_rows, out_dim), jnp.float32),
        grid_spec=pltpu.PrefetchScalarGridSpec(
            num_scalar_prefetch=0,
            grid=grid,
            in_specs=[
                # TODO(synk): sweep pipeline_mode=pl.Buffered(3) on x / w_t for
                # very deep K once DMA exposure is measured on real shapes.
                pl.BlockSpec((tm, tk), lambda i, j, k: (i, k)),   # x tile
                pl.BlockSpec((tk, tn), lambda i, j, k: (k, j)),   # weight [K, out] tile
                pl.BlockSpec((1, tn), lambda i, j, k: (0, j)),    # bias tile
            ],
            out_specs=pl.BlockSpec((tm, tn), lambda i, j, k: (i, j)),
        ),
        compiler_params=pltpu.CompilerParams(
            dimension_semantics=("parallel", "parallel", "arbitrary"),
            vmem_limit_bytes=vmem_limit,
        ),
        cost_estimate=cost,
    )(x, w_t, bias2)


if __name__ == "__main__":
    key = jax.random.PRNGKey(0)
    k_x, k_w, k_b, k_x2, k_w2, k_b2 = jax.random.split(key, 6)

    # --- Small demo consistent with the module (in_dim=32, out_dim=16) ---
    N, in_dim, out_dim = 8, 32, 16
    x = jax.random.normal(k_x, (N, in_dim), dtype=jnp.float32)
    limit = (6.0 / (in_dim + out_dim)) ** 0.5          # Glorot-uniform-like init
    weight = jax.random.uniform(k_w, (out_dim, in_dim), jnp.float32, -limit, limit)
    bias = jax.random.uniform(k_b, (out_dim,), jnp.float32, -limit, limit)

    w_t, b2, tk = prepare_dense_params(weight, bias)
    y = jax.block_until_ready(dense_forward(x, w_t, b2, tk=tk))
    assert y.shape == (N, out_dim)

    # Matched-precision reference (bf16 operands, f32 accumulation) — tight tol.
    y_ref_bf = jnp.maximum(
        jnp.dot(x.astype(jnp.bfloat16), weight.T.astype(jnp.bfloat16),
                preferred_element_type=jnp.float32) + bias, 0.0)
    assert jnp.allclose(y, y_ref_bf, atol=2e-3, rtol=2e-3)
    # Full-f32 reference — loose tol for the bf16 operand path.
    y_ref = jnp.maximum(x @ weight.T + bias, 0.0)
    assert jnp.allclose(y, y_ref, atol=5e-2, rtol=5e-2)

    # --- Larger check: multi-step K grid, K padding (1000->1024), ragged N ---
    N2, in2, out2 = 192, 1000, 272
    x2 = jax.random.normal(k_x2, (N2, in2), dtype=jnp.float32)
    lim2 = (6.0 / (in2 + out2)) ** 0.5
    w2 = jax.random.uniform(k_w2, (out2, in2), jnp.float32, -lim2, lim2)
    bv2 = jax.random.uniform(k_b2, (out2,), jnp.float32, -lim2, lim2)

    w2_t, b2_2, tk2 = prepare_dense_params(w2, bv2, tk=256)   # 4 K steps
    y2 = jax.block_until_ready(dense_forward(x2, w2_t, b2_2, tk=tk2))
    assert y2.shape == (N2, out2)

    y2_ref_bf = jnp.maximum(
        jnp.dot(x2.astype(jnp.bfloat16), w2.T.astype(jnp.bfloat16),
                preferred_element_type=jnp.float32) + bv2, 0.0)
    assert jnp.allclose(y2, y2_ref_bf, atol=2e-3, rtol=2e-3)
    y2_ref = jnp.maximum(x2 @ w2.T + bv2, 0.0)
    assert jnp.allclose(y2, y2_ref, atol=1e-1, rtol=1e-1)

    print("KERNEL_OK")
</pallas_src>

<mosaic_0001>
module attributes {stable_mosaic.version = 11 : i64} {
  func.func @dense_kernel(%arg0: i32, %arg1: i32, %arg2: i32, %arg3: memref<8x128xf32, #tpu.memory_space<vmem>>, %arg4: memref<128x16xbf16, #tpu.memory_space<vmem>>, %arg5: memref<1x16xf32, #tpu.memory_space<vmem>>, %arg6: memref<8x16xf32, #tpu.memory_space<vmem>>) attributes {dimension_semantics = [#tpu.dimension_semantics<parallel>, #tpu.dimension_semantics<parallel>, #tpu.dimension_semantics<arbitrary>], iteration_bounds = array<i64: 1, 1, 1>, scalar_prefetch = 0 : i64, scratch_operands = 0 : i64, tpu.core_type = #tpu.core_type<tc>, window_params = [{transform_indices = @transform_0, window_bounds = array<i64: 8, 128>}, {transform_indices = @transform_1, window_bounds = array<i64: 128, 16>}, {transform_indices = @transform_2, window_bounds = array<i64: 1, 16>}, {transform_indices = @transform_3, window_bounds = array<i64: 8, 16>}]} {
    %c0_i32 = arith.constant 0 : i32
    %0 = arith.cmpi eq, %arg2, %c0_i32 : i32
    %1 = arith.extui %0 : i1 to i32
    %c0_i32_0 = arith.constant 0 : i32
    %2 = arith.cmpi ne, %1, %c0_i32_0 : i32
    scf.if %2 {
      %c0_10 = arith.constant 0 : index
      %c0_11 = arith.constant 0 : index
      %13 = vector.load %arg5[%c0_10, %c0_11] : memref<1x16xf32, #tpu.memory_space<vmem>>, vector<1x16xf32>
      %14 = vector.shape_cast %13 : vector<1x16xf32> to vector<1x16xf32>
      %15 = vector.broadcast %14 : vector<1x16xf32> to vector<8x16xf32>
      %c0_12 = arith.constant 0 : index
      %c0_13 = arith.constant 0 : index
      %16 = vector.load %arg6[%c0_12, %c0_13] : memref<8x16xf32, #tpu.memory_space<vmem>>, vector<8x16xf32>
      tpu.vector_store %arg6[%c0_12, %c0_13], %15 {strides = array<i32>} : memref<8x16xf32, #tpu.memory_space<vmem>>, vector<8x16xf32>,
    } else {
    }
    %c0 = arith.constant 0 : index
    %c0_1 = arith.constant 0 : index
    %3 = vector.load %arg6[%c0, %c0_1] : memref<8x16xf32, #tpu.memory_space<vmem>>, vector<8x16xf32>
    %c0_2 = arith.constant 0 : index
    %c0_3 = arith.constant 0 : index
    %4 = vector.load %arg3[%c0_2, %c0_3] : memref<8x128xf32, #tpu.memory_space<vmem>>, vector<8x128xf32>
    %5 = arith.truncf %4 : vector<8x128xf32> to vector<8x128xbf16>
    %c0_4 = arith.constant 0 : index
    %c0_5 = arith.constant 0 : index
    %6 = vector.load %arg4[%c0_4, %c0_5] : memref<128x16xbf16, #tpu.memory_space<vmem>>, vector<128x16xbf16>
    %cst = arith.constant dense<0.000000e+00> : vector<8x16xf32>
    %7 = tpu.matmul %5, %6, %cst {dimension_numbers = #tpu.dot_dimension_numbers<[1], [0], [0], [1], [0, 0, 1, 1], [], []>} : vector<8x128xbf16>, vector<128x16xbf16>, vector<8x16xf32> -> vector<8x16xf32>
    %8 = arith.addf %3, %7 : vector<8x16xf32>
    %c0_6 = arith.constant 0 : index
    %c0_7 = arith.constant 0 : index
    %9 = vector.load %arg6[%c0_6, %c0_7] : memref<8x16xf32, #tpu.memory_space<vmem>>, vector<8x16xf32>
    tpu.vector_store %arg6[%c0_6, %c0_7], %8 {strides = array<i32>} : memref<8x16xf32, #tpu.memory_space<vmem>>, vector<8x16xf32>,
    %c0_i32_8 = arith.constant 0 : i32
    %10 = arith.cmpi eq, %arg2, %c0_i32_8 : i32
    %11 = arith.extui %10 : i1 to i32
    %c0_i32_9 = arith.constant 0 : i32
    %12 = arith.cmpi ne, %11, %c0_i32_9 : i32
    scf.if %12 {
      %c0_10 = arith.constant 0 : index
      %c0_11 = arith.constant 0 : index
      %13 = vector.load %arg6[%c0_10, %c0_11] : memref<8x16xf32, #tpu.memory_space<vmem>>, vector<8x16xf32>
      %cst_12 = arith.constant 0.000000e+00 : f32
      %14 = vector.broadcast %cst_12 : f32 to vector<8x16xf32>
      %15 = arith.maximumf %13, %14 : vector<8x16xf32>
      %c0_13 = arith.constant 0 : index
      %c0_14 = arith.constant 0 : index
      %16 = vector.load %arg6[%c0_13, %c0_14] : memref<8x16xf32, #tpu.memory_space<vmem>>, vector<8x16xf32>
      tpu.vector_store %arg6[%c0_13, %c0_14], %15 {strides = array<i32>} : memref<8x16xf32, #tpu.memory_space<vmem>>, vector<8x16xf32>,
    } else {
    }
    return
  }
  func.func @transform_0(%arg0: i32, %arg1: i32, %arg2: i32) -> (i32, i32) {
    %c0_i32 = arith.constant 0 : i32
    return %arg0, %arg2 : i32, i32
  }
  func.func @transform_1(%arg0: i32, %arg1: i32, %arg2: i32) -> (i32, i32) {
    %c0_i32 = arith.constant 0 : i32
    return %arg2, %arg1 : i32, i32
  }
  func.func @transform_2(%arg0: i32, %arg1: i32, %arg2: i32) -> (i32, i32) {
    %c0_i32 = arith.constant 0 : i32
    %c0_i32_0 = arith.constant 0 : i32
    return %c0_i32, %arg1 : i32, i32
  }
  func.func @transform_3(%arg0: i32, %arg1: i32, %arg2: i32) -> (i32, i32) {
    %c0_i32 = arith.constant 0 : i32
    return %arg0, %arg1 : i32, i32
  }
}

</mosaic_0001>

<bundles_post_ra>
// kernel: tpu_custom_call.1
= control target key start
LH: loop header
LB: loop body
LE: loop exit
PB: predicated region body
PF: predicated region fallthrough
CT: control target
= control target key end

     0   :  { %v232_v1 = vmov 0.0   ;;  %vm233_vm0 = vmmov 0   ;;  %vm27_vm1 = vcmask 130048   ;;  %s300_s0 = inlined_call_operand.vmem [shape: f32[8,128], index: 0, kind: input, shape index: {}]   ;;  %s301_s1 = inlined_call_operand.vmem [shape: bf16[128,16], index: 1, kind: input, shape index: {}]   ;;  %s302_s2 = inlined_call_operand.vmem [shape: f32[1,16], index: 2, kind: input, shape index: {}]   ;;  %s303_s3 = inlined_call_operand.hbm [shape: f32[8,16], index: 3, kind: output, shape index: {}]  }
   0x1   :  { %v200_v0 = vld [vmem:[%s301_s1] sm:$0xff]   ;;  %177 = vmatprep.subr.bf16.mxu0 %v232_v1  ;;  %v201_v2 = vld [vmem:[%s301_s1 + $0x8] sm:$0xff]   ;;  %193 = vmatprep.mubr.msk.bf16.mxu0 %vm233_vm0, %v232_v1  ;;  %v202_v3 = vld [vmem:[%s301_s1 + $0x10] sm:$0xff]  }
   0x2   :  { %178 = vmatpush3.bf16.msra.mxu0 %v200_v0  ;;  %v159_v4 = vld [vmem:[%s302_s2] ss:$0 sm:$0xff] }
   0x3   :  { %179 = vmatprep.subr.bf16.mxu0 %v232_v1 }
   0x6   :  { %180 = vmatpush3.bf16.msra.mxu0 %v201_v2 }
   0x7   :  { %181 = vmatprep.subr.bf16.mxu0 %v232_v1 }
   0x8   :  { %8 = vsyncpa [#allocation3], 0  ;;  %28 = vst.msk [vmem:[#allocation2] sm:$0xff] %vm27_vm1, %v159_v4  ;;  %v203_v5 = vld [vmem:[%s301_s1 + $0x18] sm:$0xff]   ;;  %v204_v6 = vld [vmem:[%s301_s1 + $0x20] sm:$0xff]   ;;  %s234_s4 = smov [#allocation2]  }
   0x9   :  { %v205_v7 = vld [vmem:[%s301_s1 + $0x28] sm:$0xff]   ;;  %v206_v8 = vld [vmem:[%s301_s1 + $0x30] sm:$0xff]   ;;  %v207_v9 = vld [vmem:[%s301_s1 + $0x38] sm:$0xff]   ;;  %s151_s5 = sshll.u32 %s234_s4, 4  ;;  %s152_s5 = int_to_ptr.vmem [resolvable:$true] %s151_s5 }
   0xa   :  { %182 = vmatpush3.bf16.msra.mxu0 %v202_v3  ;;  %v30_v10 = vld [vmem:[%s300_s0] sm:$0xff]  ;;  %s208_s0 = scalar_lea.vmem %s152_s5, 128  ;;  %p213_p1 = scmp.lt.s32.totalorder %s152_s5, %s152_s5 }
   0xb   :  { %183 = vmatprep.subr.bf16.mxu0 %v232_v1  ;;  %v31_v11 = vpack.c.bf16 %v30_v10, %v30_v10  ;;  %p209_p0 = scmp.ne.s32.totalorder %s152_s5, %s208_s0  ;;  %p214_p2 = scmp.lt.s32.totalorder %s208_s0, %s208_s0 }
   0xd   :  { %p215_p3 = por %p214_p2, %p213_p1 }
   0xe   :  { %184 = vmatpush3.bf16.msra.mxu0 %v203_v5 }
   0xf   :  { %185 = vmatprep.subr.bf16.mxu0 %v232_v1  ;;  %v29_v12 = vld [vmem:[#allocation2] sm:$0xff]  ;;  %p216_p4 = pnand %p215_p3, %p209_p0 }
  0x12   :  { %186 = vmatpush3.bf16.msra.mxu0 %v204_v6 }
  0x13   :  { %187 = vmatprep.subr.bf16.mxu0 %v232_v1 }
  0x16   :  { %188 = vmatpush3.bf16.msra.mxu0 %v205_v7 }
  0x17   :  { %189 = vmatprep.subr.bf16.mxu0 %v232_v1 }
  0x1a   :  { %190 = vmatpush3.bf16.msra.mxu0 %v206_v8 }
  0x1b   :  { %191 = vmatprep.subr.bf16.mxu0 %v232_v1 }
  0x1e   :  { %192 = vmatpush3.bf16.msra.mxu0 %v207_v9 }
  0x21   :  { %194 = vmatmul.mubr.bf16.vlgmr.msra.gmra.mrb[0].mxu0 %v31_v11 }
  0xf4   :  { %v130_v13 = vpop.f32.mrb[0].mxu0 }
  0xf5   :  { %v136_v14 = vadd.f32 %v130_v13, %v29_v12  ;;  %v195_v15 = vpop.f32.mrb[1].mxu0 }
  0xf6   :  { %v133_v16 = vpop.f32.mrb[2].mxu0 }
  0xf7   :  { %138 = vst.msk [vmem:[#allocation2] sm:$0xff] %vm27_vm1, %v136_v14  ;;  %v196_v17 = vpop.f32.mrb[3].mxu0 }
  0xfe   :  { %v142_v18 = vld [vmem:[#allocation2] sm:$0xff] }
  0xff   :  { %v143_v19 = vmax.f32 %v142_v18, 0.0 }
 0x101   :  { %144 = vst.msk [vmem:[#allocation2] sm:$0xff] %vm27_vm1, %v143_v19 }
 0x102   :  { %219 = shalt.err (!%p216_p4)
}
 0x103   :  { %s220_s7 = scalar_lea.hbm %s303_s3, 128 }
 0x104   :  { %p221_p5 = scmp.ne.s32.totalorder %s303_s3, %s220_s7  ;;  %p224_p6 = scmp.lt.u32.totalorder %s220_s7, %s303_s3 }
 0x106   :  { %p226_p7 = pnand %p224_p6, %p221_p5 }
 0x108   :  { %229 = shalt.err (!%p226_p7)
}
 0x109   :  { %154 = dma.vmem_to_hbm [thread:$0]  %s152_s5, 128, %s303_s3, [#allocation3]  }
 0x10a   :  { %230 = dma.done.wait [#allocation3], 128  }
 0x10b   :  { %231 = vsyncadd [#allocation3], 4294967168 }
 0x10c   :  { %158 = vsyncpa [#allocation3], 1 }

</bundles_post_ra>
